<compile_context>
chip_gen: v7x
topology: tpu7x:2x2x1
jax: 0.10.0
libtpu: 0.0.40
codegen_flags: <defaults>
</compile_context>

<pallas_src>
import functools

import jax
import jax.numpy as jnp
from jax.experimental import pallas as pl
from jax.experimental.pallas import tpu as pltpu


# ------------------------------------------------------------------ kernel body

def _context_gnn_kernel(ns_ref, adj_ref, w_msg_ref, w_h_zr_ref, w_agg_ref, w_t_h_ref,
                        out_ref, *, n_kernels, graph_hops, fuse_msg_proj):
    """One grid step = one block of `bb` batch elements.

    ns_ref    : (bb, N, H)      node states (f32)
    adj_ref   : (bb, K, N, N)   per-spatial-kernel weighted adjacency (f32 or bf16)
    w_msg_ref : (K, H, H)       block-column-padded spatial weights (bf16)
    w_h_zr_ref: (H, 2H)         [Wz_h | Wr_h]                        (bf16)
    w_agg_ref : (H, 3H)         [Wz_a | Wr_a | Wt_a]                 (bf16)
    w_t_h_ref : (H, H)          Wt_h                                 (bf16)
    out_ref   : (bb, N, H)
    """
    bb, n_nodes, hidden = ns_ref.shape
    rows = bb * n_nodes

    # ---- row softmax of the adjacency (state-independent; computed once per step) ----
    adj = adj_ref[...].astype(jnp.float32).reshape(bb, n_kernels * n_nodes, n_nodes)
    m = jnp.max(adj, axis=-1, keepdims=True)
    e = jnp.exp(adj - m)
    attn = e * pl.reciprocal(jnp.sum(e, axis=-1, keepdims=True), approx=True)
    attn = attn.astype(jnp.bfloat16)                                  # MXU operand

    # ---- weights, loaded once per grid step (bf16 MXU operands) ----
    w_msg = w_msg_ref[...]        # (K, H, H)
    w_h_zr = w_h_zr_ref[...]      # (H, 2H)
    w_agg = w_agg_ref[...]        # (H, 3H)
    w_t_h = w_t_h_ref[...]        # (H, H)

    def hop(h):
        hb = h.astype(jnp.bfloat16)                                   # (rows, H)
        hb3 = hb.reshape(bb, n_nodes, hidden)

        if fuse_msg_proj:
            # Large N/H: fuse message matmul with its projection per spatial kernel so
            # the full (bb, K*N, H) message tensor is never materialized.
            agg = jnp.zeros((rows, hidden), jnp.float32)
            for k in range(n_kernels):
                a_k = attn[:, k * n_nodes:(k + 1) * n_nodes, :]       # (bb, N, N) bf16
                msg_k = jnp.einsum("bnm,bmh->bnh", a_k, hb3,
                                   preferred_element_type=jnp.float32)
                msg_k = msg_k.astype(jnp.bfloat16).reshape(rows, hidden)
                agg = agg + jnp.dot(msg_k, w_msg[k],
                                    preferred_element_type=jnp.float32)
        else:
            # Small shapes: all K messages from ONE batched MXU contraction.
            msg = jnp.einsum("bgm,bmh->bgh", attn, hb3,
                             preferred_element_type=jnp.float32)      # (bb, K*N, H)
            msg = msg.astype(jnp.bfloat16)
            agg = None
            for k in range(n_kernels):
                msg_k = msg[:, k * n_nodes:(k + 1) * n_nodes, :].reshape(rows, hidden)
                part = jnp.dot(msg_k, w_msg[k], preferred_element_type=jnp.float32)
                agg = part if agg is None else agg + part             # (rows, H) f32
        agg_b = agg.astype(jnp.bfloat16)

        # GRUStep with split/fused gate weights (no [h, agg] concatenation).
        pre_h = jnp.dot(hb, w_h_zr, preferred_element_type=jnp.float32)     # (rows, 2H)
        pre_a = jnp.dot(agg_b, w_agg, preferred_element_type=jnp.float32)   # (rows, 3H)
        z = jax.nn.sigmoid(pre_h[:, :hidden] + pre_a[:, :hidden])
        r = jax.nn.sigmoid(pre_h[:, hidden:] + pre_a[:, hidden:2 * hidden])
        rt = (r * h).astype(jnp.bfloat16)
        t = jnp.tanh(jnp.dot(rt, w_t_h, preferred_element_type=jnp.float32)
                     + pre_a[:, 2 * hidden:])
        return (1.0 - z) * h + z * t                                  # f32 blend

    h = ns_ref[...].reshape(rows, hidden)
    if graph_hops == 1:
        h = hop(h)
    else:
        # fori_loop bounds live ranges across hops (a Python loop would not).
        h = jax.lax.fori_loop(0, graph_hops, lambda _, hh: hop(hh), h)

    out_ref[...] = h.reshape(bb, n_nodes, hidden).astype(out_ref.dtype)


# ------------------------------------------------------------------ sizing helpers

def _vmem_capacity_bytes():
    try:
        return int(pltpu.get_tpu_info().vmem_capacity_bytes)
    except Exception:
        return 64 << 20          # conservative (v7x per-core VMEM)


def _vmem_footprint_bytes(bb, N, H, K, adj_itemsize, weight_buffers=2):
    """Rough upper bound: double-buffered I/O blocks + weights + live intermediates."""
    adj_blk = 2 * bb * K * N * N * adj_itemsize                 # adjacency (double-buffered)
    io_blk = 2 * (2 * bb * N * H * 4)                           # node_state in + out
    w_bytes = weight_buffers * 2 * (K * H * H + 2 * H * H + 3 * H * H + H * H)
    attn = bb * K * N * N * (4 + 2)                             # exp f32 + attn bf16
    msg = bb * K * N * H * 6                                    # f32 msg + bf16 copy (batched path)
    gru = 10 * bb * N * H * 4                                   # agg / pre_h / pre_a / z / r / t / h
    return adj_blk + io_blk + w_bytes + attn + msg + gru


def _pick_batch_block(batch, n_nodes, hidden, n_kernels, adj_itemsize, vmem_budget,
                      target_rows=256):
    """Batch elements per grid step: target >= `target_rows` folded matmul rows
    (fills the 256-wide v6e/v7x MXU and amortizes the ~0.35us/step overhead),
    capped by the VMEM footprint and rounded down to a divisor of the batch."""
    bb = min(batch, max(1, -(-target_rows // n_nodes)))
    while bb > 1 and _vmem_footprint_bytes(bb, n_nodes, hidden, n_kernels,
                                           adj_itemsize) > vmem_budget:
        bb -= 1
    while batch % bb:
        bb -= 1
    return bb


def _cost_estimate(B, N, H, K, graph_hops, adj_itemsize):
    msg_flops = 2 * B * K * N * N * H
    proj_flops = 2 * B * K * N * H * H          # padded (H,H) spatial weights
    gru_flops = 2 * B * N * H * (2 * H + 3 * H + H)
    flops = graph_hops * (msg_flops + proj_flops + gru_flops)
    transcendentals = B * K * N * N + graph_hops * 3 * B * N * H
    weight_bytes = 2 * (K * H * H + 2 * H * H + 3 * H * H + H * H)
    bytes_accessed = B * K * N * N * adj_itemsize + 2 * B * N * H * 4 + weight_bytes
    return pl.CostEstimate(flops=int(flops), transcendentals=int(transcendentals),
                           bytes_accessed=int(bytes_accessed))


# ------------------------------------------------------------------ wrapper

def context_graph_nn(node_state, adj, packed, graph_hops=1, batch_block=None,
                     vmem_limit_bytes=None):
    """node_state: (B, N, H) f32; adj: (B, K, N, N) f32 or bf16; packed: see _pack_params."""
    B, N, H = node_state.shape
    K = adj.shape[1]
    assert adj.shape == (B, K, N, N)
    assert N % 8 == 0, "node count must be a multiple of 8 (sublane tiling)"
    assert H % K == 0, "hidden_size must be divisible by n_spatial_kernels"
    assert graph_hops >= 1
    # Packed weights must have been built with the same (H, K).
    assert packed["w_msg"].shape == (K, H, H)
    assert packed["w_h_zr"].shape == (H, 2 * H)
    assert packed["w_agg"].shape == (H, 3 * H)
    assert packed["w_t_h"].shape == (H, H)

    adj_itemsize = jnp.dtype(adj.dtype).itemsize
    vmem_cap = _vmem_capacity_bytes()

    if batch_block is None:
        bb = _pick_batch_block(B, N, H, K, adj_itemsize, vmem_budget=int(0.7 * vmem_cap))
    else:
        bb = batch_block
    assert B % bb == 0, "batch_block must divide the batch size"

    # Constant-index weights: single-buffer once they are big enough to matter
    # (double-buffering a ~20 MiB weight set wastes a third of v7x's 64 MiB VMEM).
    weight_bytes = (K * H * H + 2 * H * H + 3 * H * H + H * H) * packed["w_msg"].dtype.itemsize
    single_buffer_weights = weight_bytes >= (2 << 20)

    def _w_spec(shape, imap):
        if single_buffer_weights:
            return pl.BlockSpec(shape, imap, pipeline_mode=pl.Buffered(1))
        return pl.BlockSpec(shape, imap)

    # Fuse message matmul + projection per k when the materialized msg tensor would be big.
    fuse_msg_proj = (bb * K * N * H * 6) > (4 << 20)

    # Always derive the scoped-VMEM limit from the actual footprint (defaults are 16/32 MiB).
    footprint = _vmem_footprint_bytes(bb, N, H, K, adj_itemsize,
                                      weight_buffers=1 if single_buffer_weights else 2)
    if vmem_limit_bytes is None:
        vmem_limit_bytes = min(max(int(1.25 * footprint), 32 << 20), int(0.95 * vmem_cap))

    kernel = functools.partial(_context_gnn_kernel, n_kernels=K, graph_hops=graph_hops,
                               fuse_msg_proj=fuse_msg_proj)

    return pl.pallas_call(
        kernel,
        out_shape=jax.ShapeDtypeStruct((B, N, H), node_state.dtype),
        grid_spec=pltpu.PrefetchScalarGridSpec(
            num_scalar_prefetch=0,
            grid=(B // bb,),
            in_specs=[
                pl.BlockSpec((bb, N, H), lambda i: (i, 0, 0)),         # node_state block
                pl.BlockSpec((bb, K, N, N), lambda i: (i, 0, 0, 0)),   # adjacency block
                _w_spec((K, H, H), lambda i: (0, 0, 0)),               # padded spatial weights
                _w_spec((H, 2 * H), lambda i: (0, 0)),                 # [Wz_h | Wr_h]
                _w_spec((H, 3 * H), lambda i: (0, 0)),                 # [Wz_a | Wr_a | Wt_a]
                _w_spec((H, H), lambda i: (0, 0)),                     # Wt_h
            ],
            out_specs=pl.BlockSpec((bb, N, H), lambda i: (i, 0, 0)),
        ),
        compiler_params=pltpu.CompilerParams(
            dimension_semantics=("parallel",),
            vmem_limit_bytes=vmem_limit_bytes),
        cost_estimate=_cost_estimate(B, N, H, K, graph_hops, adj_itemsize),
    )(node_state, adj, packed["w_msg"], packed["w_h_zr"], packed["w_agg"], packed["w_t_h"])


# ------------------------------------------------------------------ parameters

def _init_params(key, hidden_size, n_spatial_kernels):
    """f32 master weights in torch (out, in) layout, U(-1/sqrt(fan_in), 1/sqrt(fan_in))."""
    H, K = hidden_size, n_spatial_kernels
    assert H % K == 0
    Hk = H // K
    k_wk, k_wz, k_wr, k_wt = jax.random.split(key, 4)

    def uni(k, shape, fan_in):
        bound = 1.0 / jnp.sqrt(float(fan_in))
        return jax.random.uniform(k, shape, jnp.float32, -bound, bound)

    return {
        "wk": uni(k_wk, (K, Hk, H), H),        # spatial-kernel Linear(H -> H/K), no bias
        "wz": uni(k_wz, (H, 2 * H), 2 * H),    # GRUStep linears (H, 2H), no bias
        "wr": uni(k_wr, (H, 2 * H), 2 * H),
        "wt": uni(k_wt, (H, 2 * H), 2 * H),
    }


def _pack_params(params, hidden_size, n_spatial_kernels, dtype=jnp.bfloat16):
    """Repack weights for the kernel: padded spatial weights + split/fused GRU gates (bf16)."""
    H, K = hidden_size, n_spatial_kernels
    assert H % K == 0
    Hk = H // K
    assert params["wk"].shape == (K, Hk, H)

    # w_msg[k][:, k*Hk:(k+1)*Hk] = Wk^T : per-kernel projections accumulate by addition.
    # (For Hk a multiple of 128, narrow (H, Hk) weights + lane-aligned scratch stores
    #  would save the Kx padded FLOPs; at small H the padded layout is the better trade.)
    w_msg = jnp.zeros((K, H, H), jnp.float32)
    for k in range(K):
        w_msg = w_msg.at[k, :, k * Hk:(k + 1) * Hk].set(params["wk"][k].T)

    wz_t, wr_t, wt_t = params["wz"].T, params["wr"].T, params["wt"].T      # (2H, H)
    w_h_zr = jnp.concatenate([wz_t[:H], wr_t[:H]], axis=1)                 # (H, 2H)
    w_agg = jnp.concatenate([wz_t[H:], wr_t[H:], wt_t[H:]], axis=1)        # (H, 3H)
    w_t_h = wt_t[:H]                                                       # (H, H)

    return {
        "w_msg": w_msg.astype(dtype),
        "w_h_zr": w_h_zr.astype(dtype),
        "w_agg": w_agg.astype(dtype),
        "w_t_h": w_t_h.astype(dtype),
    }


def _reference(node_state, adj, params, graph_hops=1):
    """Pure-JAX f32 reference mirroring the PyTorch forward (for validation)."""
    K = adj.shape[1]
    A = jax.nn.softmax(adj, axis=-1)
    h = node_state
    for _ in range(graph_hops):
        parts = [jnp.einsum("bnm,bmh->bnh", A[:, k], h) @ params["wk"][k].T
                 for k in range(K)]
        agg = jnp.concatenate(parts, axis=-1)
        cat = jnp.concatenate([h, agg], axis=-1)
        z = jax.nn.sigmoid(cat @ params["wz"].T)
        r = jax.nn.sigmoid(cat @ params["wr"].T)
        t = jnp.tanh(jnp.concatenate([r * h, agg], axis=-1) @ params["wt"].T)
        h = (1.0 - z) * h + z * t
    return h


if __name__ == "__main__":
    B, N, H, K = 2, 16, 32, 4      # batch, nodes, hidden_size, n_spatial_kernels

    key = jax.random.PRNGKey(0)
    k_ns, k_adj, k_par = jax.random.split(key, 3)
    node_state = jax.random.normal(k_ns, (B, N, H), jnp.float32)
    adj = jax.random.normal(k_adj, (B, K, N, N), jnp.float32)

    params = _init_params(k_par, H, K)          # f32 master weights (reference)
    packed = _pack_params(params, H, K)         # bf16 packed weights (kernel)

    # 1-hop (module default configuration).
    out = jax.block_until_ready(context_graph_nn(node_state, adj, packed, graph_hops=1))
    assert out.shape == (B, N, H)
    ref = _reference(node_state, adj, params, graph_hops=1)
    err1 = float(jnp.max(jnp.abs(out - ref)))
    # bf16 MXU operands + approx softmax reciprocal => loosened tolerance vs f32 reference.
    assert jnp.allclose(out, ref, atol=3e-2, rtol=3e-2), f"1-hop mismatch (max abs err {err1})"

    # 2-hop: exercises the lax.fori_loop hop path (bf16 error compounds -> looser tolerance).
    out2 = jax.block_until_ready(context_graph_nn(node_state, adj, packed, graph_hops=2))
    ref2 = _reference(node_state, adj, params, graph_hops=2)
    err2 = float(jnp.max(jnp.abs(out2 - ref2)))
    assert jnp.allclose(out2, ref2, atol=1e-1, rtol=1e-1), f"2-hop mismatch (max abs err {err2})"

    print("KERNEL_OK")
</pallas_src>

<mosaic_0001>
module attributes {stable_mosaic.version = 11 : i64} {
  func.func @_context_gnn_kernel(%arg0: i32, %arg1: memref<2x16x32xf32, #tpu.memory_space<vmem>>, %arg2: memref<2x4x16x16xf32, #tpu.memory_space<vmem>>, %arg3: memref<4x32x32xbf16, #tpu.memory_space<vmem>>, %arg4: memref<32x64xbf16, #tpu.memory_space<vmem>>, %arg5: memref<32x96xbf16, #tpu.memory_space<vmem>>, %arg6: memref<32x32xbf16, #tpu.memory_space<vmem>>, %arg7: memref<2x16x32xf32, #tpu.memory_space<vmem>>) attributes {dimension_semantics = [#tpu.dimension_semantics<parallel>], iteration_bounds = array<i64: 1>, scalar_prefetch = 0 : i64, scratch_operands = 0 : i64, tpu.core_type = #tpu.core_type<tc>, window_params = [{transform_indices = @transform_0, window_bounds = array<i64: 2, 16, 32>}, {transform_indices = @transform_1, window_bounds = array<i64: 2, 4, 16, 16>}, {pipeline_mode = #tpu.pipeline_mode<synchronous>, transform_indices = @transform_2, window_bounds = array<i64: 4, 32, 32>}, {pipeline_mode = #tpu.pipeline_mode<synchronous>, transform_indices = @transform_3, window_bounds = array<i64: 32, 64>}, {pipeline_mode = #tpu.pipeline_mode<synchronous>, transform_indices = @transform_4, window_bounds = array<i64: 32, 96>}, {pipeline_mode = #tpu.pipeline_mode<synchronous>, transform_indices = @transform_5, window_bounds = array<i64: 32, 32>}, {transform_indices = @transform_6, window_bounds = array<i64: 2, 16, 32>}]} {
    %c0 = arith.constant 0 : index
    %c0_0 = arith.constant 0 : index
    %c0_1 = arith.constant 0 : index
    %c0_2 = arith.constant 0 : index
    %0 = vector.load %arg2[%c0, %c0_0, %c0_1, %c0_2] : memref<2x4x16x16xf32, #tpu.memory_space<vmem>>, vector<2x4x16x16xf32>
    %1 = vector.shape_cast %0 : vector<2x4x16x16xf32> to vector<2x64x16xf32>
    %cst = arith.constant dense<0xFF800000> : vector<2x64xf32>
    %2 = vector.multi_reduction <maximumf>, %1, %cst [2] : vector<2x64x16xf32> to vector<2x64xf32>
    %3 = vector.shape_cast %2 : vector<2x64xf32> to vector<2x64x1xf32>
    %4 = vector.broadcast %3 : vector<2x64x1xf32> to vector<2x64x16xf32>
    %5 = arith.subf %1, %4 : vector<2x64x16xf32>
    %6 = math.exp %5 : vector<2x64x16xf32>
    %cst_3 = arith.constant dense<0.000000e+00> : vector<2x64xf32>
    %7 = vector.multi_reduction <add>, %6, %cst_3 [2] : vector<2x64x16xf32> to vector<2x64xf32>
    %8 = vector.shape_cast %7 : vector<2x64xf32> to vector<2x64x1xf32>
    %9 = tpu.reciprocal %8 {approx = true} : vector<2x64x1xf32> -> vector<2x64x1xf32>
    %10 = vector.broadcast %9 : vector<2x64x1xf32> to vector<2x64x16xf32>
    %11 = arith.mulf %6, %10 : vector<2x64x16xf32>
    %12 = arith.truncf %11 : vector<2x64x16xf32> to vector<2x64x16xbf16>
    %c0_4 = arith.constant 0 : index
    %c0_5 = arith.constant 0 : index
    %c0_6 = arith.constant 0 : index
    %13 = vector.load %arg3[%c0_4, %c0_5, %c0_6] : memref<4x32x32xbf16, #tpu.memory_space<vmem>>, vector<4x32x32xbf16>
    %c0_7 = arith.constant 0 : index
    %c0_8 = arith.constant 0 : index
    %14 = vector.load %arg4[%c0_7, %c0_8] : memref<32x64xbf16, #tpu.memory_space<vmem>>, vector<32x64xbf16>
    %c0_9 = arith.constant 0 : index
    %c0_10 = arith.constant 0 : index
    %15 = vector.load %arg5[%c0_9, %c0_10] : memref<32x96xbf16, #tpu.memory_space<vmem>>, vector<32x96xbf16>
    %c0_11 = arith.constant 0 : index
    %c0_12 = arith.constant 0 : index
    %16 = vector.load %arg6[%c0_11, %c0_12] : memref<32x32xbf16, #tpu.memory_space<vmem>>, vector<32x32xbf16>
    %c0_13 = arith.constant 0 : index
    %c0_14 = arith.constant 0 : index
    %c0_15 = arith.constant 0 : index
    %17 = vector.load %arg1[%c0_13, %c0_14, %c0_15] : memref<2x16x32xf32, #tpu.memory_space<vmem>>, vector<2x16x32xf32>
    %18 = vector.shape_cast %17 : vector<2x16x32xf32> to vector<32x32xf32>
    %19 = arith.truncf %18 : vector<32x32xf32> to vector<32x32xbf16>
    %20 = vector.shape_cast %19 : vector<32x32xbf16> to vector<2x16x32xbf16>
    "tpu.trace_start"() <{level = 10 : i32, message = "bgm,bmh->bgh"}> : () -> ()
    %cst_16 = arith.constant dense<0.000000e+00> : vector<2x64x32xf32>
    %21 = tpu.matmul %12, %20, %cst_16 {dimension_numbers = #tpu.dot_dimension_numbers<[2], [1], [1], [2], [0, 0, 0, 1, 1, 2], [0], [0]>} : vector<2x64x16xbf16>, vector<2x16x32xbf16>, vector<2x64x32xf32> -> vector<2x64x32xf32>
    "tpu.trace_stop"() : () -> ()
    %22 = arith.truncf %21 : vector<2x64x32xf32> to vector<2x64x32xbf16>
    %23 = vector.extract_strided_slice %22 {offsets = [0, 0, 0], sizes = [2, 16, 32], strides = [1, 1, 1]} : vector<2x64x32xbf16> to vector<2x16x32xbf16>
    %24 = vector.shape_cast %23 : vector<2x16x32xbf16> to vector<32x32xbf16>
    %25 = vector.extract_strided_slice %13 {offsets = [0, 0, 0], sizes = [1, 32, 32], strides = [1, 1, 1]} : vector<4x32x32xbf16> to vector<1x32x32xbf16>
    %26 = vector.shape_cast %25 : vector<1x32x32xbf16> to vector<32x32xbf16>
    %cst_17 = arith.constant dense<0.000000e+00> : vector<32x32xf32>
    %27 = tpu.matmul %24, %26, %cst_17 {dimension_numbers = #tpu.dot_dimension_numbers<[1], [0], [0], [1], [0, 0, 1, 1], [], []>} : vector<32x32xbf16>, vector<32x32xbf16>, vector<32x32xf32> -> vector<32x32xf32>
    %28 = vector.extract_strided_slice %22 {offsets = [0, 16, 0], sizes = [2, 16, 32], strides = [1, 1, 1]} : vector<2x64x32xbf16> to vector<2x16x32xbf16>
    %29 = vector.shape_cast %28 : vector<2x16x32xbf16> to vector<32x32xbf16>
    %30 = vector.extract_strided_slice %13 {offsets = [1, 0, 0], sizes = [1, 32, 32], strides = [1, 1, 1]} : vector<4x32x32xbf16> to vector<1x32x32xbf16>
    %31 = vector.shape_cast %30 : vector<1x32x32xbf16> to vector<32x32xbf16>
    %cst_18 = arith.constant dense<0.000000e+00> : vector<32x32xf32>
    %32 = tpu.matmul %29, %31, %cst_18 {dimension_numbers = #tpu.dot_dimension_numbers<[1], [0], [0], [1], [0, 0, 1, 1], [], []>} : vector<32x32xbf16>, vector<32x32xbf16>, vector<32x32xf32> -> vector<32x32xf32>
    %33 = arith.addf %27, %32 : vector<32x32xf32>
    %34 = vector.extract_strided_slice %22 {offsets = [0, 32, 0], sizes = [2, 16, 32], strides = [1, 1, 1]} : vector<2x64x32xbf16> to vector<2x16x32xbf16>
    %35 = vector.shape_cast %34 : vector<2x16x32xbf16> to vector<32x32xbf16>
    %36 = vector.extract_strided_slice %13 {offsets = [2, 0, 0], sizes = [1, 32, 32], strides = [1, 1, 1]} : vector<4x32x32xbf16> to vector<1x32x32xbf16>
    %37 = vector.shape_cast %36 : vector<1x32x32xbf16> to vector<32x32xbf16>
    %cst_19 = arith.constant dense<0.000000e+00> : vector<32x32xf32>
    %38 = tpu.matmul %35, %37, %cst_19 {dimension_numbers = #tpu.dot_dimension_numbers<[1], [0], [0], [1], [0, 0, 1, 1], [], []>} : vector<32x32xbf16>, vector<32x32xbf16>, vector<32x32xf32> -> vector<32x32xf32>
    %39 = arith.addf %33, %38 : vector<32x32xf32>
    %40 = vector.extract_strided_slice %22 {offsets = [0, 48, 0], sizes = [2, 16, 32], strides = [1, 1, 1]} : vector<2x64x32xbf16> to vector<2x16x32xbf16>
    %41 = vector.shape_cast %40 : vector<2x16x32xbf16> to vector<32x32xbf16>
    %42 = vector.extract_strided_slice %13 {offsets = [3, 0, 0], sizes = [1, 32, 32], strides = [1, 1, 1]} : vector<4x32x32xbf16> to vector<1x32x32xbf16>
    %43 = vector.shape_cast %42 : vector<1x32x32xbf16> to vector<32x32xbf16>
    %cst_20 = arith.constant dense<0.000000e+00> : vector<32x32xf32>
    %44 = tpu.matmul %41, %43, %cst_20 {dimension_numbers = #tpu.dot_dimension_numbers<[1], [0], [0], [1], [0, 0, 1, 1], [], []>} : vector<32x32xbf16>, vector<32x32xbf16>, vector<32x32xf32> -> vector<32x32xf32>
    %45 = arith.addf %39, %44 : vector<32x32xf32>
    %46 = arith.truncf %45 : vector<32x32xf32> to vector<32x32xbf16>
    %cst_21 = arith.constant dense<0.000000e+00> : vector<32x64xf32>
    %47 = tpu.matmul %19, %14, %cst_21 {dimension_numbers = #tpu.dot_dimension_numbers<[1], [0], [0], [1], [0, 0, 1, 1], [], []>} : vector<32x32xbf16>, vector<32x64xbf16>, vector<32x64xf32> -> vector<32x64xf32>
    %cst_22 = arith.constant dense<0.000000e+00> : vector<32x96xf32>
    %48 = tpu.matmul %46, %15, %cst_22 {dimension_numbers = #tpu.dot_dimension_numbers<[1], [0], [0], [1], [0, 0, 1, 1], [], []>} : vector<32x32xbf16>, vector<32x96xbf16>, vector<32x96xf32> -> vector<32x96xf32>
    %49 = vector.extract_strided_slice %47 {offsets = [0, 0], sizes = [32, 32], strides = [1, 1]} : vector<32x64xf32> to vector<32x32xf32>
    %50 = vector.extract_strided_slice %48 {offsets = [0, 0], sizes = [32, 32], strides = [1, 1]} : vector<32x96xf32> to vector<32x32xf32>
    %51 = arith.addf %49, %50 : vector<32x32xf32>
    %52 = arith.negf %51 : vector<32x32xf32>
    %53 = math.exp %52 : vector<32x32xf32>
    %cst_23 = arith.constant 1.000000e+00 : f32
    %54 = vector.broadcast %cst_23 : f32 to vector<32x32xf32>
    %55 = arith.addf %54, %53 : vector<32x32xf32>
    %56 = arith.divf %54, %55 : vector<32x32xf32>
    %57 = vector.extract_strided_slice %47 {offsets = [0, 32], sizes = [32, 32], strides = [1, 1]} : vector<32x64xf32> to vector<32x32xf32>
    %58 = vector.extract_strided_slice %48 {offsets = [0, 32], sizes = [32, 32], strides = [1, 1]} : vector<32x96xf32> to vector<32x32xf32>
    %59 = arith.addf %57, %58 : vector<32x32xf32>
    %60 = arith.negf %59 : vector<32x32xf32>
    %61 = math.exp %60 : vector<32x32xf32>
    %cst_24 = arith.constant 1.000000e+00 : f32
    %62 = vector.broadcast %cst_24 : f32 to vector<32x32xf32>
    %63 = arith.addf %62, %61 : vector<32x32xf32>
    %64 = arith.divf %62, %63 : vector<32x32xf32>
    %65 = arith.mulf %64, %18 : vector<32x32xf32>
    %66 = arith.truncf %65 : vector<32x32xf32> to vector<32x32xbf16>
    %cst_25 = arith.constant dense<0.000000e+00> : vector<32x32xf32>
    %67 = tpu.matmul %66, %16, %cst_25 {dimension_numbers = #tpu.dot_dimension_numbers<[1], [0], [0], [1], [0, 0, 1, 1], [], []>} : vector<32x32xbf16>, vector<32x32xbf16>, vector<32x32xf32> -> vector<32x32xf32>
    %68 = vector.extract_strided_slice %48 {offsets = [0, 64], sizes = [32, 32], strides = [1, 1]} : vector<32x96xf32> to vector<32x32xf32>
    %69 = arith.addf %67, %68 : vector<32x32xf32>
    %70 = math.tanh %69 : vector<32x32xf32>
    %cst_26 = arith.constant 1.000000e+00 : f32
    %71 = vector.broadcast %cst_26 : f32 to vector<32x32xf32>
    %72 = arith.subf %71, %56 : vector<32x32xf32>
    %73 = arith.mulf %72, %18 : vector<32x32xf32>
    %74 = arith.mulf %56, %70 : vector<32x32xf32>
    %75 = arith.addf %73, %74 : vector<32x32xf32>
    %76 = vector.shape_cast %75 : vector<32x32xf32> to vector<2x16x32xf32>
    %c0_27 = arith.constant 0 : index
    %c0_28 = arith.constant 0 : index
    %c0_29 = arith.constant 0 : index
    %77 = vector.load %arg7[%c0_27, %c0_28, %c0_29] : memref<2x16x32xf32, #tpu.memory_space<vmem>>, vector<2x16x32xf32>
    tpu.vector_store %arg7[%c0_27, %c0_28, %c0_29], %76 {strides = array<i32>} : memref<2x16x32xf32, #tpu.memory_space<vmem>>, vector<2x16x32xf32>,
    return
  }
  func.func @transform_0(%arg0: i32) -> (i32, i32, i32) {
    %c0_i32 = arith.constant 0 : i32
    %c0_i32_0 = arith.constant 0 : i32
    %c0_i32_1 = arith.constant 0 : i32
    return %arg0, %c0_i32, %c0_i32_0 : i32, i32, i32
  }
  func.func @transform_1(%arg0: i32) -> (i32, i32, i32, i32) {
    %c0_i32 = arith.constant 0 : i32
    %c0_i32_0 = arith.constant 0 : i32
    %c0_i32_1 = arith.constant 0 : i32
    %c0_i32_2 = arith.constant 0 : i32
    return %arg0, %c0_i32, %c0_i32_0, %c0_i32_1 : i32, i32, i32, i32
  }
  func.func @transform_2(%arg0: i32) -> (i32, i32, i32) {
    %c0_i32 = arith.constant 0 : i32
    %c0_i32_0 = arith.constant 0 : i32
    %c0_i32_1 = arith.constant 0 : i32
    %c0_i32_2 = arith.constant 0 : i32
    return %c0_i32, %c0_i32_0, %c0_i32_1 : i32, i32, i32
  }
  func.func @transform_3(%arg0: i32) -> (i32, i32) {
    %c0_i32 = arith.constant 0 : i32
    %c0_i32_0 = arith.constant 0 : i32
    %c0_i32_1 = arith.constant 0 : i32
    return %c0_i32, %c0_i32_0 : i32, i32
  }
  func.func @transform_4(%arg0: i32) -> (i32, i32) {
    %c0_i32 = arith.constant 0 : i32
    %c0_i32_0 = arith.constant 0 : i32
    %c0_i32_1 = arith.constant 0 : i32
    return %c0_i32, %c0_i32_0 : i32, i32
  }
  func.func @transform_5(%arg0: i32) -> (i32, i32) {
    %c0_i32 = arith.constant 0 : i32
    %c0_i32_0 = arith.constant 0 : i32
    %c0_i32_1 = arith.constant 0 : i32
    return %c0_i32, %c0_i32_0 : i32, i32
  }
  func.func @transform_6(%arg0: i32) -> (i32, i32, i32) {
    %c0_i32 = arith.constant 0 : i32
    %c0_i32_0 = arith.constant 0 : i32
    %c0_i32_1 = arith.constant 0 : i32
    return %arg0, %c0_i32, %c0_i32_0 : i32, i32, i32
  }
}

</mosaic_0001>

<bundles_post_ra>
// kernel: tpu_custom_call.1
= control target key start
LH: loop header
LB: loop body
LE: loop exit
PB: predicated region body
PF: predicated region fallthrough
CT: control target
= control target key end

     0   :  { %11 = vsyncpa [#allocation3], 0  ;;  %s1844_s0 = inlined_call_operand.hbm [shape: f32[2,16,32], index: 0, kind: input, shape index: {}]   ;;  %s1845_s1 = inlined_call_operand.hbm [shape: f32[2,4,16,16], index: 1, kind: input, shape index: {}]   ;;  %s1846_s2 = inlined_call_operand.hbm [shape: bf16[4,32,32], index: 2, kind: input, shape index: {}]   ;;  %s1847_s3 = inlined_call_operand.hbm [shape: bf16[32,64], index: 3, kind: input, shape index: {}]   ;;  %s1848_s4 = inlined_call_operand.hbm [shape: bf16[32,96], index: 4, kind: input, shape index: {}]   ;;  %s1849_s5 = inlined_call_operand.vmem [shape: bf16[32,32], index: 5, kind: input, shape index: {}]   ;;  %s1850_s6 = inlined_call_operand.hbm [shape: f32[2,16,32], index: 6, kind: output, shape index: {}]  }
   0x1   :  { %12 = vsyncpa [#allocation6], 0 }
   0x2   :  { %13 = vsyncpa [#allocation9], 0 }
   0x3   :  { %14 = vsyncpa [#allocation4], 0  ;;  %s1505_s21 = smov [#allocation5]   ;;  %s1365_s25 = scalar_lea.hbm %s1845_s1, 2048 }
   0x4   :  { %s32_s22 = sshll.u32 %s1505_s21, 4  ;;  %p1366_p0 = scmp.ne.s32.totalorder %s1845_s1, %s1365_s25  ;;  %s33_s22 = int_to_ptr.vmem [resolvable:$true] %s32_s22 }
   0x5   :  { %p1369_p1 = scmp.lt.u32.totalorder %s1365_s25, %s1845_s1 }
   0x7   :  { %p1371_p2 = pnand %p1369_p1, %p1366_p0 }
   0x9   :  { %1374 = shalt.err (!%p1371_p2)
}
   0xa   :  { %s1375_s30 = scalar_lea.vmem %s33_s22, 2048  ;;  %p1380_p4 = scmp.lt.s32.totalorder %s33_s22, %s33_s22 }
   0xb   :  { %p1376_p3 = scmp.ne.s32.totalorder %s33_s22, %s1375_s30  ;;  %p1381_p5 = scmp.lt.s32.totalorder %s1375_s30, %s1375_s30 }
   0xd   :  { %p1382_p6 = por %p1381_p5, %p1380_p4 }
   0xf   :  { %p1383_p7 = pnand %p1382_p6, %p1376_p3 }
  0x11   :  { %1386 = shalt.err (!%p1383_p7)
}
  0x12   :  { %s1506_s7 = smov 128   ;;  %s1507_s8 = smov 8  }
  0x13   :  { %38 = dma.hbm_to_vmem [thread:$0]  %s1845_s1, 2048, %s33_s22, [#allocation6], %s1506_s7, %s1506_s7, %s1507_s8  }
  0x14   :  { %s1508_s11 = smov [#allocation8]   ;;  %s1509_s13 = smov [#allocation2]  }
  0x15   :  { %s56_s12 = sshll.u32 %s1508_s11, 4  ;;  %s20_s14 = sshll.u32 %s1509_s13, 4  ;;  %s57_s12 = int_to_ptr.vmem [resolvable:$true] %s56_s12  ;;  %s21_s14 = int_to_ptr.vmem [resolvable:$true] %s20_s14 }
  0x16   :  { %s1387_s17 = scalar_lea.hbm %s1847_s3, 256 }
  0x17   :  { %p1388_p8 = scmp.ne.s32.totalorder %s1847_s3, %s1387_s17  ;;  %p1391_p9 = scmp.lt.u32.totalorder %s1387_s17, %s1847_s3 }
  0x19   :  { %p1393_p10 = pnand %p1391_p9, %p1388_p8 }
  0x1b   :  { %1396 = shalt.err (!%p1393_p10)
}
  0x1c   :  { %s1397_s1 = scalar_lea.vmem %s57_s12, 256  ;;  %p1402_p12 = scmp.lt.s32.totalorder %s57_s12, %s57_s12 }
  0x1d   :  { %p1398_p11 = scmp.ne.s32.totalorder %s57_s12, %s1397_s1  ;;  %p1403_p13 = scmp.lt.s32.totalorder %s1397_s1, %s1397_s1 }
  0x1f   :  { %p1404_p0 = por %p1403_p13, %p1402_p12 }
  0x21   :  { %p1405_p1 = pnand %p1404_p0, %p1398_p11 }
  0x23   :  { %1408 = shalt.err (!%p1405_p1)
}
  0x24   :  { %s1510_s22 = smov 64   ;;  %s1511_s23 = smov 4  }
  0x25   :  { %62 = dma.hbm_to_vmem [thread:$0]  %s1847_s3, 256, %s57_s12, [#allocation9], %s1510_s22, %s1510_s22, %s1511_s23  }
  0x26   :  { %s1409_s28 = scalar_lea.hbm %s1844_s0, 512 }
  0x27   :  { %p1410_p2 = scmp.ne.s32.totalorder %s1844_s0, %s1409_s28  ;;  %p1413_p3 = scmp.lt.u32.totalorder %s1409_s28, %s1844_s0 }
  0x29   :  { %p1415_p4 = pnand %p1413_p3, %p1410_p2 }
  0x2b   :  { %1418 = shalt.err (!%p1415_p4)
}
  0x2c   :  { %s1419_s11 = scalar_lea.vmem %s21_s14, 512  ;;  %p1424_p6 = scmp.lt.s32.totalorder %s21_s14, %s21_s14 }
  0x2d   :  { %p1420_p5 = scmp.ne.s32.totalorder %s21_s14, %s1419_s11  ;;  %p1425_p7 = scmp.lt.s32.totalorder %s1419_s11, %s1419_s11 }
  0x2f   :  { %p1426_p8 = por %p1425_p7, %p1424_p6 }
  0x31   :  { %p1427_p9 = pnand %p1426_p8, %p1420_p5 }
  0x33   :  { %1430 = shalt.err (!%p1427_p9)
}
  0x34   :  { %26 = dma.hbm_to_vmem [thread:$0]  %s1844_s0, 512, %s21_s14, [#allocation3], %s1506_s7, %s1506_s7, %s1507_s8  }
  0x35   :  { %s1512_s13 = smov [#allocation7]   ;;  %s1513_s16 = smov [#allocation10]  }
  0x36   :  { %s44_s15 = sshll.u32 %s1512_s13, 4  ;;  %s68_s17 = sshll.u32 %s1513_s16, 4  ;;  %s45_s15 = int_to_ptr.vmem [resolvable:$true] %s44_s15  ;;  %s69_s17 = int_to_ptr.vmem [resolvable:$true] %s68_s17 }
  0x37   :  { %s1431_s20 = scalar_lea.hbm %s1846_s2, 1024 }
  0x38   :  { %p1432_p10 = scmp.ne.s32.totalorder %s1846_s2, %s1431_s20  ;;  %p1435_p11 = scmp.lt.u32.totalorder %s1431_s20, %s1846_s2 }
  0x3a   :  { %p1437_p12 = pnand %p1435_p11, %p1432_p10 }
  0x3c   :  { %1440 = shalt.err (!%p1437_p12)
}
  0x3d   :  { %s1441_s0 = scalar_lea.vmem %s45_s15, 1024  ;;  %p1446_p0 = scmp.lt.s32.totalorder %s45_s15, %s45_s15 }
  0x3e   :  { %p1442_p13 = scmp.ne.s32.totalorder %s45_s15, %s1441_s0  ;;  %p1447_p1 = scmp.lt.s32.totalorder %s1441_s0, %s1441_s0 }
  0x40   :  { %p1448_p2 = por %p1447_p1, %p1446_p0 }
  0x42   :  { %p1449_p3 = pnand %p1448_p2, %p1442_p13 }
  0x44   :  { %1452 = shalt.err (!%p1449_p3)
}
  0x45   :  { %50 = dma.hbm_to_vmem [thread:$0]  %s1846_s2, 1024, %s45_s15, [#allocation6], %s1510_s22, %s1510_s22, %s1511_s23  }
  0x46   :  { %s1453_s29 = scalar_lea.hbm %s1848_s4, 256 }
  0x47   :  { %p1454_p4 = scmp.ne.s32.totalorder %s1848_s4, %s1453_s29  ;;  %p1457_p5 = scmp.lt.u32.totalorder %s1453_s29, %s1848_s4 }
  0x49   :  { %p1459_p6 = pnand %p1457_p5, %p1454_p4 }
  0x4b   :  { %1462 = shalt.err (!%p1459_p6)
}
  0x4c   :  { %s1463_s3 = scalar_lea.vmem %s69_s17, 256  ;;  %p1468_p8 = scmp.lt.s32.totalorder %s69_s17, %s69_s17 }
  0x4d   :  { %p1464_p7 = scmp.ne.s32.totalorder %s69_s17, %s1463_s3  ;;  %p1469_p9 = scmp.lt.s32.totalorder %s1463_s3, %s1463_s3 }
  0x4f   :  { %p1470_p10 = por %p1469_p9, %p1468_p8 }
  0x51   :  { %p1471_p11 = pnand %p1470_p10, %p1464_p7 }
  0x53   :  { %1474 = shalt.err (!%p1471_p11)
}
  0x54   :  { %74 = dma.hbm_to_vmem [thread:$0]  %s1848_s4, 256, %s69_s17, [#allocation9], %s1510_s22, %s1510_s22, %s1511_s23  }
  0x55   :  { %1497 = dma.done.wait [#allocation3], 512  }
  0x56   :  { %1498 = vsyncadd [#allocation3], 4294966784 }
  0x57   :  { %1499 = dma.done.wait [#allocation6], 3072  }
  0x58   :  { %1500 = vsyncadd [#allocation6], 4294964224 }
  0x59   :  { %1501 = dma.done.wait [#allocation9], 512  }
  0x5a   :  { %1502 = vsyncadd [#allocation9], 4294966784  ;;  %vm109_vm0 = vcmask 130048   ;;  %v93_v0 = vld [vmem:[#allocation5] sm:$0xff]  ;;  %v95_v1 = vld [vmem:[#allocation5 + $0x10] sm:$0xff]  ;;  %vm502_vm1 = vcmask 261120  }
  0x5b   :  { %v94_v2 = vld [vmem:[#allocation5 + $0x8] sm:$0xff]  ;;  %v110_v3 = vsel %vm109_vm0, %v93_v0, -inf  ;;  %v116_v4 = vsel %vm109_vm0, %v95_v1, -inf  ;;  %v96_v5 = vld [vmem:[#allocation5 + $0x18] sm:$0xff]  ;;  %v101_v6 = vld [vmem:[#allocation5 + $0x40] sm:$0xff]  ;;  %s1514_s4 = smov 32  }
  0x5c   :  { %111 = vmax.xlane.f32.xlu0 %v110_v3  ;;  %117 = vmax.xlane.f32.xlu1 %v116_v4  ;;  %v102_v7 = vld [vmem:[#allocation5 + $0x48] sm:$0xff]  ;;  %v113_v8 = vsel %vm109_vm0, %v94_v2, -inf  ;;  %v119_v9 = vsel %vm109_vm0, %v96_v5, -inf  ;;  %v1631_v10 = vld [vmem:[#allocation5 + $0x50] sm:$0xff]  ;;  %v1633_v11 = vld [vmem:[#allocation5 + $0x58] sm:$0xff]  ;;  %v134_v12 = vsel %vm109_vm0, %v101_v6, -inf }
  0x5d   :  { %v137_v13 = vsel %vm109_vm0, %v102_v7, -inf  ;;  %v140_v14 = vsel %vm109_vm0, %v1631_v10, -inf  ;;  %v143_v15 = vsel %vm109_vm0, %v1633_v11, -inf  ;;  %v1641_v16 = vld [vmem:[#allocation5 + $0x20] sm:$0xff]  ;;  %v1643_v17 = vld [vmem:[#allocation5 + $0x28] sm:$0xff]  ;;  %v1649_v20 = vld [vmem:[#allocation5 + $0x30] sm:$0xff] }
  0x5e   :  { %v122_v18 = vsel %vm109_vm0, %v1641_v16, -inf  ;;  %v125_v19 = vsel %vm109_vm0, %v1643_v17, -inf  ;;  %v1651_v21 = vld [vmem:[#allocation5 + $0x38] sm:$0xff]  ;;  %v128_v22 = vsel %vm109_vm0, %v1649_v20, -inf  ;;  %v1657_v24 = vld [vmem:[#allocation5 + $0x60] sm:$0xff]  ;;  %v1659_v25 = vld [vmem:[#allocation5 + $0x68] sm:$0xff] }
  0x5f   :  { %v131_v23 = vsel %vm109_vm0, %v1651_v21, -inf  ;;  %v146_v26 = vsel %vm109_vm0, %v1657_v24, -inf  ;;  %v149_v27 = vsel %vm109_vm0, %v1659_v25, -inf  ;;  %v1665_v28 = vld [vmem:[#allocation5 + $0x70] sm:$0xff]  ;;  %v1667_v29 = vld [vmem:[#allocation5 + $0x78] sm:$0xff] }
  0x60   :  { %114 = vmax.xlane.f32.xlu0 %v113_v8  ;;  %120 = vmax.xlane.f32.xlu1 %v119_v9  ;;  %v152_v30 = vsel %vm109_vm0, %v1665_v28, -inf  ;;  %v155_v31 = vsel %vm109_vm0, %v1667_v29, -inf }
  0x64   :  { %135 = vmax.xlane.f32.xlu0 %v134_v12  ;;  %138 = vmax.xlane.f32.xlu1 %v137_v13 }
  0x68   :  { %141 = vmax.xlane.f32.xlu0 %v140_v14  ;;  %144 = vmax.xlane.f32.xlu1 %v143_v15 }
  0x6c   :  { %123 = vmax.xlane.f32.xlu0 %v122_v18  ;;  %126 = vmax.xlane.f32.xlu1 %v125_v19 }
  0x70   :  { %129 = vmax.xlane.f32.xlu0 %v128_v22  ;;  %132 = vmax.xlane.f32.xlu1 %v131_v23 }
  0x74   :  { %147 = vmax.xlane.f32.xlu0 %v146_v26  ;;  %150 = vmax.xlane.f32.xlu1 %v149_v27 }
  0x78   :  { %153 = vmax.xlane.f32.xlu0 %v152_v30  ;;  %156 = vmax.xlane.f32.xlu1 %v155_v31 }
  0xe9   :  { %v112_v32 = vpop.xlane.xlu0 %111  ;;  %v118_v33 = vpop.xlane.xlu1 %117 }
  0xea   :  { %v158_v34 = vsub.f32 %v93_v0, %v112_v32  ;;  %v160_v35 = vsub.f32 %v95_v1, %v118_v33 }
  0xec   :  { %v174_v36 = vmul.f32 1.442695, %v158_v34  ;;  %v178_v37 = vmul.f32 1.442695, %v160_v35 }
  0xed   :  { %v115_v38 = vpop.xlane.xlu0 %114  ;;  %v121_v39 = vpop.xlane.xlu1 %120 }
  0xee   :  { %1277 = vpow2.f32 %v174_v36  ;;  %v159_v40 = vsub.f32 %v94_v2, %v115_v38  ;;  %v161_v41 = vsub.f32 %v96_v5, %v121_v39 }
  0xef   :  { %1279 = vpow2.f32 %v178_v37 }
  0xf0   :  { %v176_v42 = vmul.f32 1.442695, %v159_v40  ;;  %v180_v43 = vmul.f32 1.442695, %v161_v41 }
  0xf1   :  { %v136_v44 = vpop.xlane.xlu0 %135  ;;  %v139_v45 = vpop.xlane.xlu1 %138 }
  0xf2   :  { %1281 = vpow2.f32 %v176_v42  ;;  %v166_v46 = vsub.f32 %v101_v6, %v136_v44  ;;  %v167_v47 = vsub.f32 %v102_v7, %v139_v45 }
  0xf3   :  { %1283 = vpow2.f32 %v180_v43 }
  0xf4   :  { %v190_v48 = vmul.f32 1.442695, %v166_v46  ;;  %v192_v49 = vmul.f32 1.442695, %v167_v47 }
  0xf5   :  { %v142_v50 = vpop.xlane.xlu0 %141  ;;  %v145_v51 = vpop.xlane.xlu1 %144 }
  0xf6   :  { %1285 = vpow2.f32 %v190_v48  ;;  %v168_v52 = vsub.f32 %v1631_v10, %v142_v50  ;;  %v169_v53 = vsub.f32 %v1633_v11, %v145_v51  ;;  %v1747_v48 = vld [vmem:[#allocation2] sm:$0xff]  ;;  %v1757_v51 = vld [vmem:[#allocation2 + $0x10] sm:$0xff] }
  0xf7   :  { %1287 = vpow2.f32 %v192_v49  ;;  %v1749_v49 = vld [vmem:[#allocation2 + $0x8] sm:$0xff] }
  0xf8   :  { %v1675_v54 = vpop.eup %1277  ;;  %v194_v55 = vmul.f32 1.442695, %v168_v52  ;;  %v196_v56 = vmul.f32 1.442695, %v169_v53  ;;  %v1753_v50 = vpack.c.bf16 %v1749_v49, %v1747_v48  ;;  %v1759_v52 = vld [vmem:[#allocation2 + $0x18] sm:$0xff] }
  0xf9   :  { %v1677_v57 = vpop.eup %1279  ;;  %v124_v58 = vpop.xlane.xlu0 %123  ;;  %v206_v59 = vsel %vm109_vm0, %v1675_v54, 0.0  ;;  %v1763_v53 = vpack.c.bf16 %v1759_v52, %v1757_v51 }
  0xfa   :  { %v127_v60 = vpop.xlane.xlu1 %126  ;;  %1289 = vpow2.f32 %v194_v55  ;;  %v162_v61 = vsub.f32 %v1641_v16, %v124_v58  ;;  %207 = vadd.xlane.f32.xlu0 %v206_v59  ;;  %v212_v63 = vsel %vm109_vm0, %v1677_v57, 0.0  ;;  %1163 = vmatprep.subr.bf16.mxu0 %v1753_v50  ;;  %v1263_v55 = vld [vmem:[#allocation7 + $0x10] sm:$0xff]  }
  0xfb   :  { %v163_v62 = vsub.f32 %v1643_v17, %v127_v60  ;;  %1291 = vpow2.f32 %v196_v56  ;;  %1164 = vmatpush3.bf16.msra.mxu0 %v1753_v50  ;;  %1173 = vmatprep.subr.bf16.mxu1 %v1763_v53 }
  0xfc   :  { %v1685_v0 = vpop.eup %1281  ;;  %v182_v1 = vmul.f32 1.442695, %v162_v61  ;;  %1174 = vmatpush3.bf16.msra.mxu1 %v1763_v53  ;;  %1183 = vmatprep.subr.bf16.mxu0 %v1263_v55 }
  0xfd   :  { %v184_v2 = vmul.f32 1.442695, %v163_v62  ;;  %v1687_v3 = vpop.eup %1283  ;;  %v130_v4 = vpop.xlane.xlu0 %129  ;;  %v209_v5 = vsel %vm109_vm0, %v1685_v0, 0.0 }
  0xfe   :  { %v133_v6 = vpop.xlane.xlu1 %132  ;;  %1293 = vpow2.f32 %v182_v1  ;;  %v164_v7 = vsub.f32 %v1649_v20, %v130_v4  ;;  %213 = vadd.xlane.f32.xlu0 %v212_v63  ;;  %210 = vadd.xlane.f32.xlu1 %v209_v5  ;;  %v215_v9 = vsel %vm109_vm0, %v1687_v3, 0.0 }
  0xff   :  { %v165_v8 = vsub.f32 %v1651_v21, %v133_v6  ;;  %1295 = vpow2.f32 %v184_v2 }
 0x100   :  { %v1695_v10 = vpop.eup %1285  ;;  %v186_v11 = vmul.f32 1.442695, %v164_v7 }
 0x101   :  { %v188_v12 = vmul.f32 1.442695, %v165_v8  ;;  %v1697_v13 = vpop.eup %1287  ;;  %v148_v14 = vpop.xlane.xlu0 %147  ;;  %v230_v15 = vsel %vm109_vm0, %v1695_v10, 0.0 }
 0x102   :  { %v151_v16 = vpop.xlane.xlu1 %150  ;;  %1297 = vpow2.f32 %v186_v11  ;;  %v170_v17 = vsub.f32 %v1657_v24, %v148_v14  ;;  %216 = vadd.xlane.f32.xlu1 %v215_v9  ;;  %231 = vadd.xlane.f32.xlu0 %v230_v15  ;;  %v233_v19 = vsel %vm109_vm0, %v1697_v13, 0.0 }
 0x103   :  { %v171_v18 = vsub.f32 %v1659_v25, %v151_v16  ;;  %1299 = vpow2.f32 %v188_v12 }
 0x104   :  { %v1705_v20 = vpop.eup %1289  ;;  %v198_v21 = vmul.f32 1.442695, %v170_v17 }
 0x105   :  { %v200_v22 = vmul.f32 1.442695, %v171_v18  ;;  %v1707_v23 = vpop.eup %1291  ;;  %v154_v26 = vpop.xlane.xlu0 %153  ;;  %v236_v27 = vsel %vm109_vm0, %v1705_v20, 0.0 }
 0x106   :  { %v157_v30 = vpop.xlane.xlu1 %156  ;;  %1301 = vpow2.f32 %v198_v21  ;;  %v172_v24 = vsub.f32 %v1665_v28, %v154_v26  ;;  %234 = vadd.xlane.f32.xlu1 %v233_v19  ;;  %237 = vadd.xlane.f32.xlu0 %v236_v27  ;;  %v239_v31 = vsel %vm109_vm0, %v1707_v23, 0.0 }
 0x107   :  { %v173_v25 = vsub.f32 %v1667_v29, %v157_v30  ;;  %1303 = vpow2.f32 %v200_v22 }
 0x108   :  { %v1715_v32 = vpop.eup %1293  ;;  %v202_v33 = vmul.f32 1.442695, %v172_v24 }
 0x109   :  { %v204_v34 = vmul.f32 1.442695, %v173_v25  ;;  %v1717_v35 = vpop.eup %1295  ;;  %v218_v36 = vsel %vm109_vm0, %v1715_v32, 0.0 }
 0x10a   :  { %1305 = vpow2.f32 %v202_v33  ;;  %240 = vadd.xlane.f32.xlu1 %v239_v31  ;;  %219 = vadd.xlane.f32.xlu0 %v218_v36  ;;  %v221_v28 = vsel %vm109_vm0, %v1717_v35, 0.0 }
 0x10b   :  { %1307 = vpow2.f32 %v204_v34 }
 0x10c   :  { %v1723_v29 = vpop.eup %1297 }
 0x10d   :  { %v1725_v37 = vpop.eup %1299  ;;  %v224_v38 = vsel %vm109_vm0, %v1723_v29, 0.0 }
 0x10e   :  { %222 = vadd.xlane.f32.xlu1 %v221_v28  ;;  %225 = vadd.xlane.f32.xlu0 %v224_v38  ;;  %v227_v39 = vsel %vm109_vm0, %v1725_v37, 0.0 }
 0x110   :  { %v1731_v40 = vpop.eup %1301 }
 0x111   :  { %v1733_v41 = vpop.eup %1303  ;;  %v242_v42 = vsel %vm109_vm0, %v1731_v40, 0.0 }
 0x112   :  { %228 = vadd.xlane.f32.xlu1 %v227_v39  ;;  %243 = vadd.xlane.f32.xlu0 %v242_v42  ;;  %v245_v43 = vsel %vm109_vm0, %v1733_v41, 0.0 }
 0x114   :  { %v1739_v44 = vpop.eup %1305 }
 0x115   :  { %v1741_v45 = vpop.eup %1307  ;;  %v248_v46 = vsel %vm109_vm0, %v1739_v44, 0.0 }
 0x116   :  { %246 = vadd.xlane.f32.xlu1 %v245_v43  ;;  %249 = vadd.xlane.f32.xlu0 %v248_v46  ;;  %v251_v47 = vsel %vm109_vm0, %v1741_v45, 0.0 }
 0x11a   :  { %252 = vadd.xlane.f32.xlu1 %v251_v47 }
 0x12b   :  { %937 = vrot.lane.b32.xlu1 %v1749_v49, %s1514_s4 }
 0x12c   :  { %935 = vrot.lane.b32.xlu0 %v1747_v48, %s1514_s4 }
 0x12f   :  { %939 = vrot.lane.b32.xlu1 %v1757_v51, %s1514_s4 }
 0x133   :  { %941 = vrot.lane.b32.xlu1 %v1759_v52, %s1514_s4 }
 0x187   :  { %v208_v56 = vpop.xlane.xlu0 %207 }
 0x188   :  { %1309 = vrcp.f32 %v208_v56 }
 0x18b   :  { %v211_v58 = vpop.xlane.xlu1 %210  ;;  %v214_v59 = vpop.xlane.xlu0 %213 }
 0x18c   :  { %1311 = vrcp.f32 %v211_v58 }
 0x18d   :  { %1313 = vrcp.f32 %v214_v59 }
 0x18f   :  { %v217_v60 = vpop.xlane.xlu1 %216  ;;  %v232_v61 = vpop.xlane.xlu0 %231 }
 0x190   :  { %1315 = vrcp.f32 %v217_v60  ;;  %v1272_v60 = vld [vmem:[#allocation8 + $0x8] sm:$0xff]  }
 0x191   :  { %1317 = vrcp.f32 %v232_v61 }
 0x192   :  { %v1310_v1 = vpop.eup %1309 }
 0x193   :  { %v235_v62 = vpop.xlane.xlu1 %234  ;;  %v238_v63 = vpop.xlane.xlu0 %237  ;;  %v270_v6 = vmul.f32 %v1310_v1, %v1675_v54 }
 0x194   :  { %1319 = vrcp.f32 %v235_v62 }
 0x195   :  { %1321 = vrcp.f32 %v238_v63 }
 0x196   :  { %v1312_v2 = vpop.eup %1311 }
 0x197   :  { %v241_v4 = vpop.xlane.xlu1 %240  ;;  %v220_v5 = vpop.xlane.xlu0 %219  ;;  %v271_v7 = vmul.f32 %v1312_v2, %v1685_v0 }
 0x198   :  { %v1314_v8 = vpop.eup %1313  ;;  %1323 = vrcp.f32 %v241_v4 }
 0x199   :  { %v286_v9 = vpack.c.bf16 %v271_v7, %v270_v6  ;;  %1325 = vrcp.f32 %v220_v5  ;;  %v272_v15 = vmul.f32 %v1314_v8, %v1677_v57  ;;  %v1266_v8 = vld [vmem:[#allocation7 + $0x8] sm:$0xff]  }
 0x19a   :  { %v1316_v11 = vpop.eup %1315 }
 0x19b   :  { %v223_v12 = vpop.xlane.xlu1 %222  ;;  %1165 = vmatprep.mubr.msk.bf16.mxu0 %vm109_vm0, %v286_v9  ;;  %v226_v14 = vpop.xlane.xlu0 %225  ;;  %v273_v16 = vmul.f32 %v1316_v11, %v1687_v3 }
 0x19c   :  { %v1318_v17 = vpop.eup %1317  ;;  %1327 = vrcp.f32 %v223_v12 }
 0x19d   :  { %v287_v18 = vpack.c.bf16 %v273_v16, %v272_v15  ;;  %1329 = vrcp.f32 %v226_v14  ;;  %v278_v21 = vmul.f32 %v1318_v17, %v1695_v10 }
 0x19e   :  { %v1320_v19 = vpop.eup %1319 }
 0x19f   :  { %v229_v54 = vpop.xlane.xlu1 %228  ;;  %1166 = vmatmul.mubr.msk.bf16.vlgmr.msra.gmra.mrb[0].mxu0 %vm109_vm0, %v287_v18  ;;  %v244_v0 = vpop.xlane.xlu0 %243  ;;  %v279_v22 = vmul.f32 %v1320_v19, %v1697_v13  ;;  %v1268_v18 = vld [vmem:[#allocation7 + $0x28] sm:$0xff]  }
 0x1a0   :  { %v1322_v26 = vpop.eup %1321  ;;  %1331 = vrcp.f32 %v229_v54  ;;  %1184 = vmatpush3.bf16.msra.mxu0 %v1263_v55 }
 0x1a1   :  { %v290_v27 = vpack.c.bf16 %v279_v22, %v278_v21  ;;  %1333 = vrcp.f32 %v244_v0  ;;  %v280_v24 = vmul.f32 %v1322_v26, %v1705_v20  ;;  %v1269_v26 = vld [vmem:[#allocation7 + $0x30] sm:$0xff]  }
 0x1a2   :  { %v1324_v57 = vpop.eup %1323 }
 0x1a3   :  { %v247_v3 = vpop.xlane.xlu1 %246  ;;  %1175 = vmatprep.mubr.msk.bf16.mxu1 %vm109_vm0, %v290_v27  ;;  %v250_v30 = vpop.xlane.xlu0 %249  ;;  %v281_v25 = vmul.f32 %v1324_v57, %v1707_v23  ;;  %v1270_v57 = vld [vmem:[#allocation7 + $0x38] sm:$0xff]  }
 0x1a4   :  { %v1326_v31 = vpop.eup %1325  ;;  %1335 = vrcp.f32 %v247_v3  ;;  %v1274_v3 = vld [vmem:[#allocation10 + $0x8] sm:$0xff]  }
 0x1a5   :  { %v291_v33 = vpack.c.bf16 %v281_v25, %v280_v24  ;;  %1337 = vrcp.f32 %v250_v30  ;;  %v274_v34 = vmul.f32 %v1326_v31, %v1715_v32 }
 0x1a6   :  { %v1328_v10 = vpop.eup %1327 }
 0x1a7   :  { %v253_v13 = vpop.xlane.xlu1 %252  ;;  %1176 = vmatmul.mubr.msk.bf16.vlgmr.msra.gmra.mrb[0].mxu1 %vm109_vm0, %v291_v33  ;;  %v275_v36 = vmul.f32 %v1328_v10, %v1717_v35  ;;  %v1330_v28 = vpop.eup %1329 }
 0x1a8   :  { %1339 = vrcp.f32 %v253_v13  ;;  %v276_v20 = vmul.f32 %v1330_v28, %v1723_v29 }
 0x1a9   :  { %v288_v38 = vpack.c.bf16 %v275_v36, %v274_v34 }
 0x1aa   :  { %v1332_v39 = vpop.eup %1331 }
 0x1ab   :  { %1169 = vmatprep.mubr.msk.bf16.mxu0 %vm109_vm0, %v288_v38  ;;  %v277_v23 = vmul.f32 %v1332_v39, %v1725_v37  ;;  %v1334_v42 = vpop.eup %1333  ;;  %v1264_v37 = vld [vmem:[#allocation7 + $0x18] sm:$0xff]   ;;  %v1275_v38 = vld [vmem:[%s1849_s5] sm:$0xff]   ;;  %v1276_v39 = vld [vmem:[%s1849_s5 + $0x8] sm:$0xff]   ;;  %s1515_s5 = smov 96  }
 0x1ac   :  { %v282_v47 = vmul.f32 %v1334_v42, %v1731_v40  ;;  %1185 = vmatprep.subr.bf16.mxu0 %v1264_v37  ;;  %v1265_v40 = vld [vmem:[#allocation7] sm:$0xff]  }
 0x1ad   :  { %v289_v43 = vpack.c.bf16 %v277_v23, %v276_v20  ;;  %1186 = vmatpush3.bf16.msra.mxu0 %v1264_v37 }
 0x1ae   :  { %v1336_v46 = vpop.eup %1335  ;;  %1191 = vmatprep.subr.bf16.mxu0 %v1265_v40 }
 0x1af   :  { %1170 = vmatmul.mubr.msk.bf16.gmra.mrb[4].mxu0 %vm109_vm0, %v289_v43  ;;  %v283_v32 = vmul.f32 %v1336_v46, %v1733_v41  ;;  %v1338_v35 = vpop.eup %1337  ;;  %v1271_v41 = vld [vmem:[#allocation8] sm:$0xff]  }
 0x1b0   :  { %v284_v58 = vmul.f32 %v1338_v35, %v1739_v44  ;;  %1215 = vmatprep.subr.bf16.mxu1 %v1271_v41  ;;  %v1273_v44 = vld [vmem:[#allocation10] sm:$0xff]  }
 0x1b1   :  { %v292_v55 = vpack.c.bf16 %v283_v32, %v282_v47  ;;  %1216 = vmatpush3.bf16.msra.mxu1 %v1271_v41  ;;  %v938_v41 = vpop.permute.xlu1 %937 }
 0x1b2   :  { %v1340_v56 = vpop.eup %1339  ;;  %1217 = vmatprep.subr.bf16.mxu1 %v1272_v60 }
 0x1b3   :  { %1179 = vmatprep.mubr.msk.bf16.mxu1 %vm109_vm0, %v292_v55  ;;  %v285_v29 = vmul.f32 %v1340_v56, %v1741_v45 }
 0x1b5   :  { %v293_v59 = vpack.c.bf16 %v285_v29, %v284_v58  ;;  %1218 = vmatpush3.bf16.msra.mxu1 %v1272_v60 }
 0x1b6   :  { %1223 = vmatprep.subr.bf16.mxu1 %v1273_v44 }
 0x1b7   :  { %1180 = vmatmul.mubr.msk.bf16.gmra.mrb[4].mxu1 %vm109_vm0, %v293_v59 }
 0x1b8   :  { %1219 = vmatprep.mubr.msk.bf16.mxu1 %vm502_vm1, %v1753_v50 }
 0x1bf   :  { %1220 = vmatmul.mubr.msk.bf16.vlgmr.msra.gmra.mrb[8].mxu1 %vm502_vm1, %v1763_v53  ;;  %v1267_v53 = vld [vmem:[#allocation7 + $0x20] sm:$0xff]  }
 0x1c0   :  { %1224 = vmatpush3.bf16.msra.mxu1 %v1273_v44 }
 0x1c1   :  { %1225 = vmatprep.subr.bf16.mxu1 %v1274_v3 }
 0x1c4   :  { %1226 = vmatpush3.bf16.msra.mxu1 %v1274_v3 }
 0x1c5   :  { %1231 = vmatprep.subr.bf16.mxu1 %v1275_v38 }
 0x272   :  { %v1167_v45 = vpop.f32.mrb[0].mxu0 }
 0x273   :  { %v374_v61 = vpop.f32.mrb[1].mxu0 }
 0x274   :  { %v1168_v62 = vpop.f32.mrb[2].mxu0 }
 0x275   :  { %v483_v50 = vpack.c.bf16 %v1168_v62, %v1167_v45  ;;  %v377_v63 = vpop.f32.mrb[3].mxu0 }
 0x276   :  { %v482_v1 = vpack.c.bf16 %v377_v63, %v374_v61 }
 0x277   :  { %1187 = vmatprep.mubr.msk.bf16.mxu0 %vm502_vm1, %v483_v50  ;;  %v940_v50 = vpop.permute.xlu1 %939 }
 0x27a   :  { %v1177_v2 = vpop.f32.mrb[0].mxu1 }
 0x27b   :  { %v451_v4 = vpop.f32.mrb[1].mxu1 }
 0x27c   :  { %v1178_v5 = vpop.f32.mrb[2].mxu1 }
 0x27d   :  { %v487_v6 = vpack.c.bf16 %v1178_v5, %v1177_v2  ;;  %v454_v7 = vpop.f32.mrb[3].mxu1 }
 0x27e   :  { %v486_v9 = vpack.c.bf16 %v454_v7, %v451_v4  ;;  %v936_v4 = vpop.permute.xlu0 %935 }
 0x27f   :  { %1188 = vmatmul.mubr.msk.bf16.vlgmr.msra.gmra.mrb[8].mxu0 %vm502_vm1, %v487_v6 }
 0x280   :  { %1192 = vmatpush3.bf16.msra.mxu0 %v1265_v40  ;;  %1195 = vmatprep.mubr.msk.bf16.mxu0 %vm502_vm1, %v482_v1  ;;  %v942_v1 = vpop.permute.xlu1 %941 }
 0x281   :  { %1193 = vmatprep.subr.bf16.mxu0 %v1266_v8 }
 0x282   :  { %v1171_v11 = vpop.f32.mrb[4].mxu0 }
 0x283   :  { %v390_v12 = vpop.f32.mrb[5].mxu0 }
 0x284   :  { %v1172_v14 = vpop.f32.mrb[6].mxu0  ;;  %1194 = vmatpush3.bf16.msra.mxu0 %v1266_v8 }
 0x285   :  { %v485_v15 = vpack.c.bf16 %v1172_v14, %v1171_v11  ;;  %v393_v16 = vpop.f32.mrb[7].mxu0  ;;  %1199 = vmatprep.subr.bf16.mxu0 %v1267_v53 }
 0x286   :  { %v484_v17 = vpack.c.bf16 %v393_v16, %v390_v12 }
 0x28a   :  { %v1181_v19 = vpop.f32.mrb[4].mxu1 }
 0x28b   :  { %v467_v54 = vpop.f32.mrb[5].mxu1  ;;  %1196 = vmatmul.mubr.msk.bf16.vlgmr.msra.gmra.mrb[8].mxu0 %vm502_vm1, %v486_v9 }
 0x28c   :  { %1200 = vmatpush3.bf16.msra.mxu0 %v1267_v53  ;;  %v1182_v0 = vpop.f32.mrb[6].mxu1  ;;  %1203 = vmatprep.mubr.msk.bf16.mxu0 %vm502_vm1, %v484_v17 }
 0x28d   :  { %v489_v21 = vpack.c.bf16 %v1182_v0, %v1181_v19  ;;  %v470_v22 = vpop.f32.mrb[7].mxu1  ;;  %1201 = vmatprep.subr.bf16.mxu0 %v1268_v18 }
 0x28e   :  { %v488_v27 = vpack.c.bf16 %v470_v22, %v467_v54 }
 0x290   :  { %1202 = vmatpush3.bf16.msra.mxu0 %v1268_v18 }
 0x291   :  { %1207 = vmatprep.subr.bf16.mxu0 %v1269_v26 }
 0x292   :  { %v1221_v30 = vpop.f32.mrb[8].mxu1 }
 0x293   :  { %v821_v24 = vpop.f32.mrb[9].mxu1 }
 0x294   :  { %v1222_v25 = vpop.f32.mrb[10].mxu1 }
 0x295   :  { %v824_v31 = vpop.f32.mrb[11].mxu1 }
 0x297   :  { %1204 = vmatmul.mubr.msk.bf16.vlgmr.msra.gmra.mrb[8].mxu0 %vm502_vm1, %v488_v27 }
 0x298   :  { %1208 = vmatpush3.bf16.msra.mxu0 %v1269_v26  ;;  %1211 = vmatprep.mubr.msk.bf16.mxu0 %vm502_vm1, %v485_v15 }
 0x299   :  { %1209 = vmatprep.subr.bf16.mxu0 %v1270_v57 }
 0x29c   :  { %1210 = vmatpush3.bf16.msra.mxu0 %v1270_v57 }
 0x2a3   :  { %1212 = vmatmul.mubr.msk.bf16.vlgmr.msra.gmra.mrb[8].mxu0 %vm502_vm1, %v489_v21 }
 0x376   :  { %v1213_v33 = vpop.f32.mrb[8].mxu0 }
 0x377   :  { %v748_v10 = vpop.f32.mrb[9].mxu0 }
 0x378   :  { %v1214_v13 = vpop.f32.mrb[10].mxu0 }
 0x379   :  { %v768_v34 = vpack.c.bf16 %v1214_v13, %v1213_v33  ;;  %v751_v36 = vpop.f32.mrb[11].mxu0 }
 0x37a   :  { %v767_v28 = vpack.c.bf16 %v751_v36, %v748_v10 }
 0x37c   :  { %1227 = vmatprep.mubr.msk.bf16.mxu1 %vm502_vm1, %v767_v28 }
 0x37d   :  { %1228 = vmatmul.mubr.msk.bf16.vlgmr.msra.gmra.mrb[12].mxu1 %vm502_vm1, %v768_v34 }
 0x37e   :  { %1232 = vmatpush3.bf16.msra.mxu1 %v1275_v38 }
 0x37f   :  { %1233 = vmatprep.subr.bf16.mxu1 %v1276_v39 }
 0x382   :  { %1234 = vmatpush3.bf16.msra.mxu1 %v1276_v39 }
 0x450   :  { %v1229_v20 = vpop.f32.mrb[12].mxu1 }
 0x451   :  { %v905_v23 = vadd.f32 %v1229_v20, %v1221_v30  ;;  %v888_v42 = vpop.f32.mrb[13].mxu1 }
 0x452   :  { %v903_v43 = vadd.f32 %v888_v42, %v821_v24  ;;  %v1230_v46 = vpop.f32.mrb[14].mxu1 }
 0x453   :  { %v1119_v47 = vmul.f32 -1.442695, %v905_v23  ;;  %v906_v32 = vadd.f32 %v1230_v46, %v1222_v25  ;;  %v891_v35 = vpop.f32.mrb[15].mxu1 }
 0x454   :  { %v1117_v55 = vmul.f32 -1.442695, %v903_v43  ;;  %v904_v56 = vadd.f32 %v891_v35, %v824_v31 }
 0x455   :  { %1341 = vpow2.f32 %v1119_v47  ;;  %v1120_v58 = vmul.f32 -1.442695, %v906_v32 }
 0x456   :  { %1343 = vpow2.f32 %v1117_v55  ;;  %v1118_v29 = vmul.f32 -1.442695, %v904_v56 }
 0x457   :  { %1345 = vpow2.f32 %v1120_v58 }
 0x458   :  { %1347 = vpow2.f32 %v1118_v29 }
 0x45f   :  { %v1342_v59 = vpop.eup %1341 }
 0x460   :  { %v1344_v37 = vpop.eup %1343  ;;  %v921_v40 = vadd.f32 1.0, %v1342_v59 }
 0x461   :  { %v1346_v60 = vpop.eup %1345  ;;  %v919_v44 = vadd.f32 1.0, %v1344_v37 }
 0x462   :  { %v1348_v45 = vpop.eup %1347  ;;  %1349 = vrcp.f32 %v921_v40  ;;  %v922_v61 = vadd.f32 1.0, %v1346_v60 }
 0x463   :  { %1351 = vrcp.f32 %v919_v44  ;;  %v920_v62 = vadd.f32 1.0, %v1348_v45 }
 0x464   :  { %1353 = vrcp.f32 %v922_v61 }
 0x465   :  { %1355 = vrcp.f32 %v920_v62 }
 0x46c   :  { %v1350_v63 = vpop.eup %1349 }
 0x46d   :  { %v1352_v2 = vpop.eup %1351  ;;  %v949_v7 = vmul.f32 %v1350_v63, %v940_v50  ;;  %v1048_v30 = vsub.f32 1.0, %v1350_v63 }
 0x46e   :  { %v1354_v5 = vpop.eup %1353  ;;  %v947_v53 = vmul.f32 %v1352_v2, %v936_v4  ;;  %v1046_v24 = vsub.f32 1.0, %v1352_v2 }
 0x46f   :  { %v1356_v6 = vpop.eup %1355  ;;  %v950_v8 = vmul.f32 %v1354_v5, %v942_v1  ;;  %v1049_v25 = vsub.f32 1.0, %v1354_v5  ;;  %v1052_v34 = vmul.f32 %v1048_v30, %v1757_v51 }
 0x470   :  { %v948_v9 = vmul.f32 %v1356_v6, %v938_v41  ;;  %v1047_v33 = vsub.f32 1.0, %v1356_v6  ;;  %v1050_v38 = vmul.f32 %v1046_v24, %v1747_v48 }
 0x471   :  { %v952_v11 = vpack.c.bf16 %v950_v8, %v949_v7  ;;  %v1053_v23 = vmul.f32 %v1049_v25, %v1759_v52 }
 0x472   :  { %v951_v12 = vpack.c.bf16 %v948_v9, %v947_v53 }
 0x473   :  { %957 = vrot.lane.b32.xlu1 %v952_v11, %s1515_s5 }
 0x474   :  { %955 = vrot.lane.b32.xlu0 %v951_v12, %s1515_s5 }
 0x477   :  { %977 = vrot.lane.b32.xlu1 %v891_v35, %s1510_s22 }
 0x478   :  { %975 = vrot.lane.b32.xlu0 %v888_v42, %s1510_s22 }
 0x47b   :  { %981 = vrot.lane.b32.xlu1 %v1230_v46, %s1510_s22  ;;  %v1051_v46 = vmul.f32 %v1047_v33, %v1749_v49 }
 0x47c   :  { %979 = vrot.lane.b32.xlu0 %v1229_v20, %s1510_s22  ;;  %s1516_s22 = smov [#allocation11]  }
 0x47d   :  { %s1071_s17 = sshll.u32 %s1516_s22, 4  ;;  %s1072_s17 = int_to_ptr.vmem [resolvable:$true] %s1071_s17 }
 0x47e   :  { %s1475_s18 = scalar_lea.vmem %s1072_s17, 512  ;;  %p1480_p13 = scmp.lt.s32.totalorder %s1072_s17, %s1072_s17 }
 0x47f   :  { %p1476_p12 = scmp.ne.s32.totalorder %s1072_s17, %s1475_s18  ;;  %p1481_p0 = scmp.lt.s32.totalorder %s1475_s18, %s1475_s18 }
 0x481   :  { %p1482_p1 = por %p1481_p0, %p1480_p13 }
 0x483   :  { %p1483_p2 = pnand %p1482_p1, %p1476_p12 }
 0x4e5   :  { %v958_v15 = vpop.permute.xlu1 %957 }
 0x4e6   :  { %v956_v14 = vpop.permute.xlu0 %955 }
 0x4e7   :  { %1235 = vmatprep.mubr.msk.bf16.mxu1 %vm502_vm1, %v956_v14 }
 0x4e8   :  { %1236 = vmatmul.mubr.msk.bf16.vlgmr.msra.gmra.mrb[16].mxu1 %vm502_vm1, %v958_v15 }
 0x4e9   :  { %v978_v17 = vpop.permute.xlu1 %977 }
 0x4ea   :  { %v976_v16 = vpop.permute.xlu0 %975 }
 0x4ed   :  { %v982_v21 = vpop.permute.xlu1 %981 }
 0x4ee   :  { %v980_v18 = vpop.permute.xlu0 %979 }
 0x5bb   :  { %v1237_v19 = vpop.f32.mrb[16].mxu1 }
 0x5bc   :  { %v1036_v54 = vadd.f32 %v1237_v19, %v980_v18  ;;  %v1027_v0 = vpop.f32.mrb[17].mxu1 }
 0x5bd   :  { %v1028_v22 = vadd.f32 %v1027_v0, %v976_v16  ;;  %v1238_v26 = vpop.f32.mrb[18].mxu1 }
 0x5be   :  { %1357 = vtanh.f32 %v1036_v54  ;;  %v1039_v27 = vadd.f32 %v1238_v26, %v982_v21  ;;  %v1030_v57 = vpop.f32.mrb[19].mxu1 }
 0x5bf   :  { %1359 = vtanh.f32 %v1028_v22  ;;  %v1031_v3 = vadd.f32 %v1030_v57, %v978_v17 }
 0x5c0   :  { %1361 = vtanh.f32 %v1039_v27 }
 0x5c1   :  { %1363 = vtanh.f32 %v1031_v3 }
 0x5c8   :  { %v1358_v31 = vpop.eup %1357 }
 0x5c9   :  { %v1360_v10 = vpop.eup %1359  ;;  %v1056_v13 = vmul.f32 %v1358_v31, %v1350_v63 }
 0x5ca   :  { %v1362_v36 = vpop.eup %1361  ;;  %v1054_v28 = vmul.f32 %v1360_v10, %v1352_v2 }
 0x5cb   :  { %v1364_v39 = vpop.eup %1363  ;;  %v1057_v20 = vmul.f32 %v1362_v36, %v1354_v5  ;;  %v1060_v42 = vadd.f32 %v1056_v13, %v1052_v34 }
 0x5cc   :  { %v1055_v43 = vmul.f32 %v1364_v39, %v1356_v6  ;;  %v1058_v47 = vadd.f32 %v1054_v28, %v1050_v38 }
 0x5cd   :  { %v1061_v32 = vadd.f32 %v1057_v20, %v1053_v23  ;;  %1064 = vst.msk [vmem:[#allocation11 + $0x10] sm:$0xff] %vm502_vm1, %v1060_v42 }
 0x5ce   :  { %v1059_v35 = vadd.f32 %v1055_v43, %v1051_v46  ;;  %1062 = vst.msk [vmem:[#allocation11] sm:$0xff] %vm502_vm1, %v1058_v47 }
 0x5cf   :  { %1065 = vst.msk [vmem:[#allocation11 + $0x18] sm:$0xff] %vm502_vm1, %v1061_v32 }
 0x5d0   :  { %1063 = vst.msk [vmem:[#allocation11 + $0x8] sm:$0xff] %vm502_vm1, %v1059_v35 }
 0x5d1   :  { %1486 = shalt.err (!%p1483_p2)
}
 0x5d2   :  { %s1487_s21 = scalar_lea.hbm %s1850_s6, 512 }
 0x5d3   :  { %p1488_p3 = scmp.ne.s32.totalorder %s1850_s6, %s1487_s21  ;;  %p1491_p4 = scmp.lt.u32.totalorder %s1487_s21, %s1850_s6 }
 0x5d5   :  { %p1493_p5 = pnand %p1491_p4, %p1488_p3 }
 0x5d7   :  { %1496 = shalt.err (!%p1493_p5)
}
 0x5d8   :  { %1077 = dma.vmem_to_hbm [thread:$0]  %s1072_s17, 512, %s1850_s6, [#allocation4], %s1506_s7, %s1506_s7, %s1507_s8  }
 0x5d9   :  { %1503 = dma.done.wait [#allocation4], 512  }
 0x5da   :  { %1504 = vsyncadd [#allocation4], 4294966784 }
 0x5db   :  { %1081 = vsyncpa [#allocation3], 1 }
 0x5dc   :  { %1082 = vsyncpa [#allocation6], 1 }
 0x5dd   :  { %1083 = vsyncpa [#allocation9], 1 }
 0x5de   :  { %1084 = vsyncpa [#allocation4], 1 }

</bundles_post_ra>
